<compile_context>
chip_gen: v6e
topology: v6e:2x2x1
jax: 0.10.0
libtpu: 0.0.40
codegen_flags: <defaults>
</compile_context>

<pallas_src>
import math

import jax
import jax.numpy as jnp
from jax.experimental import pallas as pl
from jax.experimental.pallas import tpu as pltpu


def build_pe_table(d_model: int, max_len: int, dtype=jnp.float32) -> jnp.ndarray:
    """Sinusoidal table identical to the PyTorch __init__ (handles odd d_model).

    Build it once at module-init time in the activation dtype so the forward
    pass never pays a per-call slice+convert.
    """
    position = jnp.arange(0, max_len, dtype=jnp.float32)[:, None]            # (L, 1)
    div_term = jnp.exp(
        jnp.arange(0, d_model, 2, dtype=jnp.float32)
        * -(math.log(10000.0) / d_model)
    )                                                                         # (ceil(D/2),)
    args = position * div_term                                                # (L, ceil(D/2))
    pe = jnp.zeros((max_len, d_model), dtype=jnp.float32)
    pe = pe.at[:, 0::2].set(jnp.sin(args))                                    # ceil(D/2) cols
    pe = pe.at[:, 1::2].set(jnp.cos(args)[:, : d_model // 2])                 # floor(D/2) cols
    return pe.astype(dtype)                                                   # (L, D)


def _pe_add_kernel(x_ref, pe_ref, o_ref):
    # x_ref / o_ref: (TB, ts, D); pe_ref: (ts, D).  Pure VPU elementwise add;
    # pe broadcasts over the folded batch dim.  Explicit cast keeps the store
    # dtype-correct if inputs ever get promoted.
    o_ref[...] = (x_ref[...] + pe_ref[...]).astype(o_ref.dtype)


# Per-buffer VMEM target.  x(2) + out(2) blocks at this size plus the (small)
# pe double-buffer stay around ~8 MiB total, comfortably inside the smallest
# default scoped-VMEM budget (16 MiB on v5e; 32 MiB on v6e/v7x).  Raising this
# toward 4 MiB is a ~1-2% win on v6e but must be re-checked against v5e's
# 16 MiB scoped default and v7x's 64 MiB physical VMEM.
_TARGET_BLOCK_BYTES = 2 * 1024 * 1024

# Below this many bytes of x, pallas_call launch + pipeline ramp dwarfs the
# copy; plain JAX lets XLA fuse the broadcast-add into neighboring ops.
_SMALL_FAST_PATH_BYTES = 2 * 1024 * 1024


def positional_encoding_forward(
    x: jnp.ndarray,
    pe: jnp.ndarray,
    *,
    donate_x: bool = False,
    force_pallas: bool = False,
) -> jnp.ndarray:
    """x: (B, S, D); pe: (max_len, D).  Returns x + pe[:S] (broadcast over B).

    NOTE on dtype: the add is done in x.dtype (pe is cast once).  PyTorch
    (f32 buffer + bf16 input) would promote the output to f32; here we keep
    the activation dtype on purpose (halves pe DMA bytes for bf16 models).
    """
    B, S, D = x.shape
    if S > pe.shape[0]:
        raise ValueError(
            f"sequence length {S} exceeds positional-encoding max_len {pe.shape[0]}"
        )

    pe_slice = pe[:S, :]
    if pe_slice.dtype != x.dtype:
        pe_slice = pe_slice.astype(x.dtype)

    itemsize = jnp.dtype(x.dtype).itemsize

    if not force_pallas and x.size * itemsize <= _SMALL_FAST_PATH_BYTES:
        # Small/mid-sized fast path: Pallas overhead is not worth it here.
        return x + pe_slice[None, :, :]

    # ---- Tile sizing -------------------------------------------------------
    # D is kept whole per block: for the module's d_model=640 (= 5*128) the
    # output stores are fully lane-dense unmasked vst.
    sub = max(8, 32 // itemsize)                       # 8 f32 / 16 bf16 / 32 i8
    row_bytes = D * itemsize
    target_rows = max(sub, _TARGET_BLOCK_BYTES // max(1, row_bytes))

    # Sequence tile: whole S if it fits the VMEM target, else a sublane-aligned
    # chunk (partial last block is fine for an elementwise add).
    if S <= target_rows:
        ts = S
    else:
        ts = max(sub, (target_rows // sub) * sub)
    num_s_tiles = pl.cdiv(S, ts)

    # Batch folding: put as many batches per block as the VMEM target allows.
    tb = max(1, min(B, _TARGET_BLOCK_BYTES // max(1, ts * row_bytes)))
    num_b_tiles = pl.cdiv(B, tb)

    # Make sure the grid exposes >= 2 "parallel" steps so v7x's two
    # TensorCores both get work (no-op on single-core v5e/v6e).
    if num_s_tiles * num_b_tiles < 2 and B >= 2:
        tb = pl.cdiv(B, 2)
        num_b_tiles = pl.cdiv(B, tb)

    # Grid order: S-tiles outer, batch-tiles inner, so the pe block index is
    # constant across the inner batch loop and pe is only re-DMA'd when the
    # sequence tile changes (pe read traffic ~ S*D, not B*S*D).
    grid = (num_s_tiles, num_b_tiles)

    return pl.pallas_call(
        _pe_add_kernel,
        out_shape=jax.ShapeDtypeStruct((B, S, D), x.dtype),
        grid_spec=pltpu.PrefetchScalarGridSpec(
            num_scalar_prefetch=0,
            grid=grid,
            in_specs=[
                pl.BlockSpec((tb, ts, D), lambda s, b: (b, s, 0)),   # x tile
                pl.BlockSpec((ts, D), lambda s, b: (s, 0)),          # pe tile (reused over b)
            ],
            out_specs=pl.BlockSpec((tb, ts, D), lambda s, b: (b, s, 0)),
        ),
        compiler_params=pltpu.CompilerParams(
            # Both axes are independent -> megacore/v7x can shard the grid.
            dimension_semantics=("parallel", "parallel"),
        ),
        # Optionally write the result in place over x when the caller no
        # longer needs it (saves an output allocation for large activations).
        input_output_aliases={0: 0} if donate_x else {},
    )(x, pe_slice)


if __name__ == "__main__":
    # Shapes consistent with the module: d_model=640 (simple_d_model), max_len=50.
    B, S, D = 2, 8, 640
    MAX_LEN = 50

    key = jax.random.PRNGKey(0)
    kx, ks, kb = jax.random.split(key, 3)
    x = jax.random.normal(kx, (B, S, D), dtype=jnp.float32)
    pe = build_pe_table(d_model=D, max_len=MAX_LEN)

    # 1) Pallas path (forced, since the demo shape is below the fast-path cutoff).
    out = jax.block_until_ready(positional_encoding_forward(x, pe, force_pallas=True))
    ref = x + pe[None, :S, :]
    assert out.shape == (B, S, D)
    assert jnp.allclose(out, ref, atol=1e-6, rtol=1e-6)

    # 2) Larger batch exercising the natural (non-forced) batch-folded Pallas
    #    path: 32*50*640*4B ~ 4 MB > fast-path cutoff.
    xb = jax.random.normal(kb, (32, MAX_LEN, D), dtype=jnp.float32)
    out_big = jax.block_until_ready(positional_encoding_forward(xb, pe))
    ref_big = xb + pe[None, :MAX_LEN, :]
    assert jnp.allclose(out_big, ref_big, atol=1e-6, rtol=1e-6)

    # 3) bf16 input through the Pallas path (pe cast once; add stays in bf16).
    x_bf16 = x.astype(jnp.bfloat16)
    out_bf16 = jax.block_until_ready(
        positional_encoding_forward(x_bf16, pe, force_pallas=True))
    ref_bf16 = x_bf16 + pe[:S].astype(jnp.bfloat16)[None]
    assert out_bf16.dtype == jnp.bfloat16
    assert jnp.allclose(out_bf16.astype(jnp.float32),
                        ref_bf16.astype(jnp.float32), atol=1e-2, rtol=1e-2)

    # 4) Tiny / odd-d_model input takes the plain-JAX fast path.
    pe_odd = build_pe_table(d_model=7, max_len=MAX_LEN)
    x_small = jax.random.normal(ks, (1, 4, 7), dtype=jnp.float32)
    out_small = jax.block_until_ready(positional_encoding_forward(x_small, pe_odd))
    assert jnp.allclose(out_small, x_small + pe_odd[None, :4, :], atol=1e-6, rtol=1e-6)

    # 5) S > max_len must raise (PyTorch would shape-error on the add).
    try:
        positional_encoding_forward(
            jnp.zeros((1, MAX_LEN + 1, D), jnp.float32), pe)
        raise AssertionError("expected ValueError for S > max_len")
    except ValueError:
        pass

    # TODO(synk): nn.Dropout path not implemented (enable_dropout=False by default).
    print("KERNEL_OK")
</pallas_src>

<mosaic_0001>
module attributes {stable_mosaic.version = 11 : i64} {
  func.func @_pe_add_kernel(%arg0: i32, %arg1: i32, %arg2: memref<1x8x640xf32, #tpu.memory_space<vmem>>, %arg3: memref<8x640xf32, #tpu.memory_space<vmem>>, %arg4: memref<1x8x640xf32, #tpu.memory_space<vmem>>) attributes {dimension_semantics = [#tpu.dimension_semantics<parallel>, #tpu.dimension_semantics<parallel>], iteration_bounds = array<i64: 1, 2>, scalar_prefetch = 0 : i64, scratch_operands = 0 : i64, tpu.core_type = #tpu.core_type<tc>, window_params = [{transform_indices = @transform_0, window_bounds = array<i64: 1, 8, 640>}, {transform_indices = @transform_1, window_bounds = array<i64: 8, 640>}, {transform_indices = @transform_2, window_bounds = array<i64: 1, 8, 640>}]} {
    %c0 = arith.constant 0 : index
    %c0_0 = arith.constant 0 : index
    %c0_1 = arith.constant 0 : index
    %0 = vector.load %arg2[%c0, %c0_0, %c0_1] : memref<1x8x640xf32, #tpu.memory_space<vmem>>, vector<1x8x640xf32>
    %c0_2 = arith.constant 0 : index
    %c0_3 = arith.constant 0 : index
    %1 = vector.load %arg3[%c0_2, %c0_3] : memref<8x640xf32, #tpu.memory_space<vmem>>, vector<8x640xf32>
    %2 = vector.shape_cast %1 : vector<8x640xf32> to vector<1x8x640xf32>
    %3 = arith.addf %0, %2 : vector<1x8x640xf32>
    %c0_4 = arith.constant 0 : index
    %c0_5 = arith.constant 0 : index
    %c0_6 = arith.constant 0 : index
    %4 = vector.load %arg4[%c0_4, %c0_5, %c0_6] : memref<1x8x640xf32, #tpu.memory_space<vmem>>, vector<1x8x640xf32>
    tpu.vector_store %arg4[%c0_4, %c0_5, %c0_6], %3 {strides = array<i32>} : memref<1x8x640xf32, #tpu.memory_space<vmem>>, vector<1x8x640xf32>,
    return
  }
  func.func @transform_0(%arg0: i32, %arg1: i32) -> (i32, i32, i32) {
    %c0_i32 = arith.constant 0 : i32
    %c0_i32_0 = arith.constant 0 : i32
    return %arg1, %arg0, %c0_i32 : i32, i32, i32
  }
  func.func @transform_1(%arg0: i32, %arg1: i32) -> (i32, i32) {
    %c0_i32 = arith.constant 0 : i32
    %c0_i32_0 = arith.constant 0 : i32
    return %arg0, %c0_i32 : i32, i32
  }
  func.func @transform_2(%arg0: i32, %arg1: i32) -> (i32, i32, i32) {
    %c0_i32 = arith.constant 0 : i32
    %c0_i32_0 = arith.constant 0 : i32
    return %arg1, %arg0, %c0_i32 : i32, i32, i32
  }
}

</mosaic_0001>

<bundles_post_ra>
// kernel: tpu_custom_call.1
= control target key start
LH: loop header
LB: loop body
LE: loop exit
PB: predicated region body
PF: predicated region fallthrough
CT: control target
= control target key end

     0   :  { %7 = vsyncpa [#allocation3], 0  ;;  %s745_s0 = inlined_call_operand.hbm [shape: f32[2,8,640], index: 0, kind: input, shape index: {}]   ;;  %s746_s1 = inlined_call_operand.hbm [shape: f32[8,640], index: 1, kind: input, shape index: {}]   ;;  %s747_s2 = inlined_call_operand.hbm [shape: f32[2,8,640], index: 2, kind: output, shape index: {}]  }
   0x1   :  { %9 = vsyncpa [#allocation3 + $0x1], 0 }
   0x2   :  { %10 = vsyncpa [#allocation6], 0 }
   0x3   :  { %11 = vsyncpa [#allocation4], 0 }
   0x4   :  { %13 = vsyncpa [#allocation4 + $0x1], 0  ;;  %s578_s9 = smov 0   ;;  %s580_s10 = smov 0  }
   0x5   :  { %s582_s11 = smov 0   ;;  %s584_s12 = smov 0  }
   0x6   :  { %s586_s13 = smov 0   ;;  %s588_s14 = smov 0  }
   0x7 LB: > { %s332_s15 = sadd.s32 4294967295, %s558_s14   ;;  %s333_s16 = sadd.s32 4294967294, %s558_s14   ;;  %s558_s14 = sphi %s588_s14, %s19_s14   ;;  %s554_s13 = sphi %s586_s13, %s764_s13   ;;  %s550_s12 = sphi %s584_s12, %s763_s12   ;;  %s546_s11 = sphi %s582_s11, %s762_s11   ;;  %s542_s10 = sphi %s580_s10, %s761_s10   ;;  %s538_s9 = sphi %s578_s9, %s760_s9  }
   0x8   : > { %p53_p0 = scmp.ne.s32.totalorder %s542_s10, %s538_s9  ;;  %p612_p1 = scmp.eq.s32.totalorder %s332_s15, 0 }
   0x9   : > { %p616_p2 = scmp.eq.s32.totalorder %s332_s15, 1  ;;  %p111_p3 = scmp.eq.s32.totalorder %s333_s16, 1 }
   0xa   : > { %p622_p4 = por %p612_p1, %p53_p0  ;;  %p334_p5 = scmp.ge.s32.totalorder %s558_s14, 1 }
   0xb   : > { %p627_p6 = por %p111_p3, %p53_p0  ;;  %p118_p7 = scmp.lt.s32.totalorder %s558_s14, 3 }
   0xc   : > { %s751_s19 = scalar_select %p622_p4, 1, 0 }
   0xd   : > { %s752_s20 = scalar_select %p627_p6, 1, 0 }
   0xe   : > { %p632_p8 = pnand %p334_p5, %p118_p7  ;;  %s560_s22 = smov [#allocation5]  }
   0xf   : > { %s134_s23 = sshll.u32 %s560_s22, 4  ;;  %s28_s25 = sadd.s32 1, %s554_s13  ;;  %s135_s23 = int_to_ptr.vmem [resolvable:$true] %s134_s23 }
  0x10   : > { %p355_p10 = pneg %p632_p8  ;;  %s40_s26 = sadd.s32 1, %s546_s11 }
  0x11   : > { %p29_p12 = scmp.ge.s32.totalorder %s28_s25, 2  ;;  %s431_s27 = scalar_lea.vmem %s135_s23, 640 }
  0x12   : > { %p641_p11 = pnand %p355_p10, %p612_p1  ;;  %p432_p0 = scmp.ne.s32.totalorder %s135_s23, %s431_s27 }
  0x13   : > { %p439_p7 = scmp.lt.s32.totalorder %s135_s23, %s135_s23  ;;  %p440_p6 = scmp.lt.s32.totalorder %s431_s27, %s431_s27 }
  0x14   : > { %p422_p13 = pneg %p641_p11 }
  0x15   : > { %p441_p9 = por %p440_p6, %p439_p7 }
  0x16   : > { %p434_p3 = pnand %p432_p0, %p422_p13 }
  0x18   : > { %p435_p5 = pneg %p434_p3 }
  0x1a   : > { %p442_p4 = pnand %p441_p9, %p435_p5 }
  0x1c   : > { %445 = shalt.err (!%p442_p4)
}
  0x1d   : > { %358 = dma.hbm_to_vmem [thread:$0]  (!%p641_p11), %s746_s1, 640, %s135_s23, [#allocation6]  }
  0x1e   : > { %s766_s25 = smov (%p29_p12, %s28_s25), 0  ;;  %p47_p6 = scmp.ne.s32.totalorder %s546_s11, %s542_s10 }
  0x1f   : > { %p48_p4 = scmp.eq.s32.totalorder %s558_s14, 0  ;;  %s35_s30 = ssub.s32 %s554_s13, %s766_s25 }
  0x20   : > { %p368_p9 = scmp.lt.s32.totalorder %s558_s14, 2  ;;  %p38_p10 = scmp.eq.s32.totalorder %s35_s30, 0 }
  0x21   : > { %p49_p13 = por %p48_p4, %p47_p6  ;;  %p664_p0 = por %p616_p2, %p47_p6 }
  0x22   : > { %s145_s4 = sand.u32 1, %s546_s11   ;;  %s344_s7 = smul.u32 640, %s554_s13 }
  0x23   : > { %s670_s5 = scalar_select %p38_p10, %s546_s11, %s40_s26  }
  0x24   : > { %s343_s6 = smul.u32 40, %s145_s4  ;;  %p673_p11 = pnand %p368_p9, %p49_p13 }
  0x25   : > { %s157_s22 = scalar_lea.hbm %s745_s0, %s344_s7  ;;  %s146_s24 = scalar_lea.sflag [#allocation3], %s145_s4 }
  0x26   : > { %s149_s23 = scalar_lea.vmem [#allocation2], %s343_s6  ;;  %p448_p2 = pneg %p673_p11 }
  0x27   : > { %s159_s18 = sshll.u32 %s149_s23, 4  ;;  %s561_s26 = smov [#allocation2]   ;;  %s160_s18 = int_to_ptr.vmem [resolvable:$true] %s159_s18 }
  0x28   : > { %s459_s27 = scalar_lea.vmem %s160_s18, 640  ;;  %s464_s28 = sshll.u32 %s561_s26, 4  ;;  %s465_s28 = int_to_ptr.vmem [resolvable:$false] %s464_s28 }
  0x29   : > { %p460_p12 = scmp.ne.s32.totalorder %s160_s18, %s459_s27  ;;  %s466_s29 = scalar_lea.vmem %s465_s28, 1280 }
  0x2a   : > { %p467_p7 = scmp.lt.s32.totalorder %s160_s18, %s465_s28  ;;  %p468_p6 = scmp.lt.s32.totalorder %s466_s29, %s459_s27 }
  0x2b   : > { %p462_p3 = pnand %p460_p12, %p448_p2 }
  0x2c   : > { %p469_p4 = por %p468_p6, %p467_p7 }
  0x2d   : > { %p463_p5 = pneg %p462_p3 }
  0x2f   : > { %p470_p9 = pnand %p469_p4, %p463_p5 }
  0x31   : > { %473 = shalt.err (!%p470_p9)
}
  0x32   : > { %362 = dma.hbm_to_vmem [thread:$0]  (!%p673_p11), %s157_s22, 640, %s160_s18, %s146_s24  }
  0x33   : > { %168 = sbr.rel (%p632_p8) target bundleno = 83 (0x53), region = 28  ;;  %s687_s30 = sand.u32 (!%p632_p8), 1, %s542_s10  }
  0x34   : > { %s345_s4 = smul.u32 (!%p632_p8), 40, %s687_s30  ;;  %s171_s6 = scalar_lea.sflag (!%p632_p8), [#allocation3], %s687_s30 }
  0x35   : > { %p757_p10 = scmp.ne.s32.totalorder (!%p632_p8), %s751_s19, 0 }
  0x36   : > { %s174_s7 = scalar_lea.vmem (!%p632_p8), [#allocation2], %s345_s4 }
  0x38   : > { %525 = dma.done.wait (%p757_p10), %s171_s6, 640  }
  0x39   : > { %527 = vsyncadd (%p757_p10), %s171_s6, 4294966656 }
  0x3a   : > { %529 = dma.done.wait (%p612_p1), [#allocation6], 640  }
  0x3b   : > { %531 = vsyncadd (%p612_p1), [#allocation6], 4294966656  ;;  %v199_v0 = vld [vmem:[%s174_s7] sm:$0xff]  ;;  %v204_v1 = vld [vmem:[#allocation5] sm:$0xff]  ;;  %s346_s21 = smul.u32 640, %s550_s12  ;;  %s198_s8 = scalar_lea.vmem [#allocation7], %s345_s4 }
  0x3c   : > { %v200_v2 = vld [vmem:[%s174_s7 + $0x8] sm:$0xff]  ;;  %v209_v3 = vadd.f32 %v204_v1, %v199_v0  ;;  %s236_s15 = sshll.u32 %s198_s8, 4  ;;  %v205_v4 = vld [vmem:[#allocation5 + $0x8] sm:$0xff]  ;;  %v206_v6 = vld [vmem:[#allocation5 + $0x10] sm:$0xff]  ;;  %s220_s16 = scalar_lea.sflag [#allocation4], %s687_s30  ;;  %s700_s15 = int_to_ptr.vmem [resolvable:$true] %s236_s15 }
  0x3d   : > { %v201_v5 = vld [vmem:[%s174_s7 + $0x10] sm:$0xff]  ;;  %v210_v7 = vadd.f32 %v205_v4, %v200_v2  ;;  %v202_v9 = vld [vmem:[%s174_s7 + $0x18] sm:$0xff]  ;;  %v207_v10 = vld [vmem:[#allocation5 + $0x18] sm:$0xff]  ;;  %s234_s19 = scalar_lea.hbm %s747_s2, %s346_s21  ;;  %s474_s22 = scalar_lea.vmem %s700_s15, 640 }
  0x3e   : > { %v211_v8 = vadd.f32 %v206_v6, %v201_v5  ;;  %v203_v11 = vld [vmem:[%s174_s7 + $0x20] sm:$0xff]  ;;  %214 = vst [vmem:[%s198_s8] sm:$0xff] %v209_v3  ;;  %v212_v12 = vadd.f32 %v207_v10, %v202_v9  ;;  %v208_v13 = vld [vmem:[#allocation5 + $0x20] sm:$0xff]  ;;  %p475_p1 = scmp.ne.s32.totalorder %s700_s15, %s474_s22  ;;  %s562_s23 = smov [#allocation7]  }
  0x3f   : > { %215 = vst [vmem:[%s198_s8 + $0x8] sm:$0xff] %v210_v7  ;;  %v213_v14 = vadd.f32 %v208_v13, %v203_v11  ;;  %s478_s18 = sshll.u32 %s562_s23, 4  ;;  %s479_s18 = int_to_ptr.vmem [resolvable:$false] %s478_s18 }
  0x40   : > { %216 = vst [vmem:[%s198_s8 + $0x10] sm:$0xff] %v211_v8  ;;  %217 = vst [vmem:[%s198_s8 + $0x18] sm:$0xff] %v212_v12  ;;  %p476_p8 = pnand %p475_p1, %p664_p0  ;;  %s480_s24 = scalar_lea.vmem %s479_s18, 1280 }
  0x41   : > { %218 = vst [vmem:[%s198_s8 + $0x20] sm:$0xff] %v213_v14  ;;  %p481_p11 = scmp.lt.s32.totalorder %s700_s15, %s479_s18  ;;  %p482_p2 = scmp.lt.s32.totalorder %s480_s24, %s474_s22 }
  0x42   : > { %p477_p13 = pneg %p476_p8 }
  0x43   : > { %p483_p12 = por %p482_p2, %p481_p11 }
  0x45   : > { %p484_p3 = pnand %p483_p12, %p477_p13 }
  0x47   : > { %487 = shalt.err (!%p484_p3)
}
  0x48   : > { %s488_s27 = scalar_lea.hbm %s234_s19, 640  ;;  %s492_s29 = scalar_lea.hbm %s747_s2, 1280 }
  0x49   : > { %p489_p5 = scmp.ne.s32.totalorder %s234_s19, %s488_s27  ;;  %p493_p4 = scmp.lt.s32.totalorder %s234_s19, %s747_s2 }
  0x4a   : > { %p494_p9 = scmp.lt.s32.totalorder %s492_s29, %s488_s27 }
  0x4b   : > { %p490_p7 = pnand %p489_p5, %p664_p0 }
  0x4c   : > { %p495_p10 = por %p494_p9, %p493_p4 }
  0x4d   : > { %p491_p6 = pneg %p490_p7 }
  0x4f   : > { %p496_p1 = pnand %p495_p10, %p491_p6 }
  0x51   : > { %499 = shalt.err (!%p496_p1)
}
  0x52   : > { %353 = dma.vmem_to_hbm [thread:$0]  (%p664_p0), %s700_s15, 640, %s234_s19, %s220_s16  }
  0x53 PF: > { %s248_s6 = sand.u32 1, %s538_s9   ;;  %p758_p8 = scmp.ne.s32.totalorder %s752_s20, 0 }
  0x54   : > { %p759_p13 = scmp.ge.s32.totalorder %s558_s14, 2  ;;  %s249_s7 = scalar_lea.sflag [#allocation4], %s248_s6 }
  0x56   : > { %p364_p11 = pnand %p759_p13, %p758_p8 }
  0x58   : > { %p365_p2 = pneg %p364_p11 }
  0x5a   : > { %533 = dma.done.wait (%p365_p2), %s249_s7, 640  }
  0x5b   : > { %535 = vsyncadd (%p365_p2), %s249_s7, 4294966656  ;;  %s19_s14 = sadd.s32 1, %s558_s14   ;;  %s760_s9 = smov %s542_s10 }
  0x5c   : > { %p16_p12 = scmp.ge.s32.totalorder %s19_s14, 4   ;;  %s761_s10 = smov %s546_s11 }
  0x5d   : > { %s762_s11 = smov %s670_s5  ;;  %s763_s12 = smov %s554_s13 }
  0x5e   : > { %s764_s13 = smov %s766_s25  ;;  %18 = sbr.rel (!%p16_p12) target bundleno = 7 (0x7), region = 78 }
  0x63   :  { %254 = vsyncpa [#allocation3], 1 }
  0x64   :  { %256 = vsyncpa [#allocation3 + $0x1], 1 }
  0x65   :  { %257 = vsyncpa [#allocation6], 1 }
  0x66   :  { %258 = vsyncpa [#allocation4], 1 }
  0x67   :  { %260 = vsyncpa [#allocation4 + $0x1], 1 }

</bundles_post_ra>
